<compile_context>
chip_gen: v7x
topology: tpu7x:2x2x1
jax: 0.10.0
libtpu: 0.0.40
codegen_flags: <defaults>
</compile_context>

<pallas_src>
import jax
import jax.numpy as jnp
from jax.experimental import pallas as pl
from jax.experimental.pallas import tpu as pltpu


_SUBLANE = 8
_LANE = 128
_MAX_TILE_N = 4096            # allow big row tiles for narrow class counts
_MIN_GRID_STEPS = 8           # keep pipelining alive + shard rows across v7x TCs
_FALLBACK_BYTES = 512 << 10   # below this, XLA's fused softmax wins on overhead


def _round_down(x, m):
    return (x // m) * m


def _vmem_capacity_bytes():
    try:
        return int(pltpu.get_tpu_info().vmem_capacity_bytes)
    except Exception:
        return 64 << 20   # most conservative (v7x per-TensorCore)


def _sublane_align(itemsize):
    # f32 -> 8 rows, bf16/f16 -> 16, 8-bit -> 32 (packed sublane tiling).
    return max(_SUBLANE, 32 // max(1, int(itemsize)))


def _temperature_softmax_kernel(inv_t_ref, y_ref, o_ref):
    """Numerically stable softmax(x * (1/T)) along the last (lane) axis."""
    inv_t = inv_t_ref[0]                      # runtime scalar from SMEM
    x = y_ref[...].astype(jnp.float32)
    # max is scale-invariant for T > 0, so fold 1/T into the exp argument:
    # (x - max(x)) * (1/T) == x/T - max(x/T).  Saves one full-tile multiply.
    m = jnp.max(x, axis=-1, keepdims=True)
    e = jnp.exp((x - m) * inv_t)
    s = jnp.sum(e, axis=-1, keepdims=True)
    # EUP approximate reciprocal + one Newton step on the (tile_n, 1) column:
    # avoids a full-tile VPU divide while keeping ~f32 accuracy (rows sum to 1
    # only to ~1e-6; use a true divide if bit-exact parity is ever required).
    r = pl.reciprocal(s, approx=True)
    r = r * (2.0 - s * r)
    o_ref[...] = (e * r).astype(o_ref.dtype)


def _choose_tile_n(n, c, in_itemsize, out_itemsize, target_bytes):
    """Row tile: aligned to dtype sublane packing, ~target f32 block bytes,
    capped so the grid is at least _MIN_GRID_STEPS deep."""
    align = max(_sublane_align(in_itemsize), _sublane_align(out_itemsize))
    bytes_per_row = max(1, c * 4)             # compute happens in f32
    rows = max(align, _round_down(target_bytes // bytes_per_row, align))
    depth_cap = max(align, _round_down(pl.cdiv(n, _MIN_GRID_STEPS), align))
    return max(align, min(rows, _MAX_TILE_N, depth_cap))


def temperature_softmax(y, T, *, out_dtype=None, force_pallas=False):
    """Pallas equivalent of F.softmax(y / T, dim=1) for 2-D y of shape (N, C)."""
    N, C = y.shape
    in_dtype = jnp.dtype(y.dtype)
    out_dtype = jnp.dtype(out_dtype) if out_dtype is not None else in_dtype

    # Tiny problems: pallas_call fixed launch overhead dominates; XLA's fused
    # softmax is competitive until the problem is a few blocks deep.
    if not force_pallas and N * C * in_dtype.itemsize < _FALLBACK_BYTES:
        return jax.nn.softmax(y / jnp.asarray(T, dtype=in_dtype), axis=1).astype(out_dtype)

    cap = _vmem_capacity_bytes()
    # v7x (64 MiB/TC, ~3.2 TB/s HBM) benefits from ~8 MiB blocks; ~4 MiB is
    # already ~86% of HBM roofline on v5e/v6e.
    target_bytes = (8 << 20) if cap <= (64 << 20) else (4 << 20)
    tile_n = _choose_tile_n(N, C, in_dtype.itemsize, out_dtype.itemsize, target_bytes)
    grid = (pl.cdiv(N, tile_n),)

    # 1/T as a runtime SMEM scalar: one compiled kernel serves every temperature.
    # (T == 0 yields inf/nan, matching the PyTorch module's behavior.)
    inv_t = jnp.reshape(1.0 / jnp.asarray(T, dtype=jnp.float32), (1,))

    # Explicit scoped-VMEM budget: double-buffered in/out blocks + f32 temps,
    # clamped below the physical per-core capacity (Mosaic scratch headroom).
    in_block = tile_n * C * in_dtype.itemsize
    out_block = tile_n * C * out_dtype.itemsize
    f32_block = tile_n * C * 4
    need = 2 * in_block + 2 * out_block + 2 * f32_block + (4 << 20)
    ceiling = max(24 << 20, cap - (8 << 20))
    vmem_limit = int(min(ceiling, max(32 << 20, need)))

    # TODO(synk): for vocab-scale C where even an 8-row f32 block overflows the
    # per-core VMEM (binding at ~half the C on v7x vs v6e), add a lane-tiled
    # online-softmax variant (running max/sum over C chunks in VMEM scratch).

    return pl.pallas_call(
        _temperature_softmax_kernel,
        out_shape=jax.ShapeDtypeStruct((N, C), out_dtype),
        grid_spec=pltpu.PrefetchScalarGridSpec(
            num_scalar_prefetch=0,
            grid=grid,
            in_specs=[
                pl.BlockSpec(memory_space=pltpu.MemorySpace.SMEM),  # inv_t scalar
                pl.BlockSpec((tile_n, C), lambda i: (i, 0)),
            ],
            out_specs=pl.BlockSpec((tile_n, C), lambda i: (i, 0)),
        ),
        compiler_params=pltpu.CompilerParams(
            dimension_semantics=("parallel",),   # rows independent -> megacore
            vmem_limit_bytes=vmem_limit,
        ),
    )(inv_t, y)


if __name__ == "__main__":
    # Module has no learned parameters; only the temperature hyperparameter T.
    key = jax.random.PRNGKey(0)
    k1, k2, k3, k4 = jax.random.split(key, 4)

    # (batch, num_classes) logits: (y, T, force_pallas)
    cases = [
        # lane-dense class axis, aligned batch -> straight through the kernel
        (jax.random.normal(k1, (64, 128), dtype=jnp.float32), 4.0, True),
        # small C (< 128 lanes): full-C block with masked lane-tail stores
        (jax.random.normal(k2, (16, 32), dtype=jnp.float32), 2.0, True),
        # ragged batch and class counts: tail row block + masked lane tail
        (jax.random.normal(k3, (19, 160), dtype=jnp.float32), 4.0, True),
        # large enough to take the default Pallas path (above fallback bytes)
        (jax.random.normal(k4, (1024, 256), dtype=jnp.float32), 4.0, False),
    ]

    for y, t, force in cases:
        p = jax.block_until_ready(temperature_softmax(y, t, force_pallas=force))
        p_ref = jax.nn.softmax(y / t, axis=1)
        assert p.shape == y.shape, "shape mismatch"
        assert jnp.allclose(p, p_ref, atol=1e-4, rtol=1e-4), "mismatch vs reference"
        assert jnp.allclose(jnp.sum(p, axis=1), 1.0, atol=1e-4), "rows must sum to 1"

    # bf16 writeback path (recommended on v5e: halves HBM writeback bytes).
    y_bf = jax.random.normal(k1, (32, 96), dtype=jnp.float32)
    p_bf = jax.block_until_ready(
        temperature_softmax(y_bf, 4.0, out_dtype=jnp.bfloat16, force_pallas=True))
    p_bf_ref = jax.nn.softmax(y_bf / 4.0, axis=1)
    assert p_bf.dtype == jnp.bfloat16
    assert jnp.allclose(p_bf.astype(jnp.float32), p_bf_ref, atol=1e-2, rtol=1e-2)

    print("KERNEL_OK")
</pallas_src>

<mosaic_0001>
module attributes {stable_mosaic.version = 11 : i64} {
  func.func @_temperature_softmax_kernel(%arg0: i32, %arg1: memref<1xf32, #tpu.memory_space<smem>>, %arg2: memref<8x128xf32, #tpu.memory_space<vmem>>, %arg3: memref<8x128xf32, #tpu.memory_space<vmem>>) attributes {dimension_semantics = [#tpu.dimension_semantics<parallel>], iteration_bounds = array<i64: 8>, scalar_prefetch = 0 : i64, scratch_operands = 0 : i64, tpu.core_type = #tpu.core_type<tc>, window_params = [{transform_indices = @transform_0, window_bounds = array<i64: 1>}, {transform_indices = @transform_1, window_bounds = array<i64: 8, 128>}, {transform_indices = @transform_2, window_bounds = array<i64: 8, 128>}]} {
    %c0 = arith.constant 0 : index
    %0 = memref.load %arg1[%c0] : memref<1xf32, #tpu.memory_space<smem>>
    %c0_0 = arith.constant 0 : index
    %c0_1 = arith.constant 0 : index
    %1 = vector.load %arg2[%c0_0, %c0_1] : memref<8x128xf32, #tpu.memory_space<vmem>>, vector<8x128xf32>
    %cst = arith.constant dense<0xFF800000> : vector<8xf32>
    %2 = vector.multi_reduction <maximumf>, %1, %cst [1] : vector<8x128xf32> to vector<8xf32>
    %3 = vector.shape_cast %2 : vector<8xf32> to vector<8x1xf32>
    %4 = vector.broadcast %3 : vector<8x1xf32> to vector<8x128xf32>
    %5 = arith.subf %1, %4 : vector<8x128xf32>
    %6 = vector.broadcast %0 : f32 to vector<8x128xf32>
    %7 = arith.mulf %5, %6 : vector<8x128xf32>
    %8 = math.exp %7 : vector<8x128xf32>
    %cst_2 = arith.constant dense<0.000000e+00> : vector<8xf32>
    %9 = vector.multi_reduction <add>, %8, %cst_2 [1] : vector<8x128xf32> to vector<8xf32>
    %10 = vector.shape_cast %9 : vector<8xf32> to vector<8x1xf32>
    %11 = tpu.reciprocal %10 {approx = true} : vector<8x1xf32> -> vector<8x1xf32>
    %12 = arith.mulf %10, %11 : vector<8x1xf32>
    %cst_3 = arith.constant 2.000000e+00 : f32
    %13 = vector.broadcast %cst_3 : f32 to vector<8x1xf32>
    %14 = arith.subf %13, %12 : vector<8x1xf32>
    %15 = arith.mulf %11, %14 : vector<8x1xf32>
    %16 = vector.broadcast %15 : vector<8x1xf32> to vector<8x128xf32>
    %17 = arith.mulf %8, %16 : vector<8x128xf32>
    %c0_4 = arith.constant 0 : index
    %c0_5 = arith.constant 0 : index
    %18 = vector.load %arg3[%c0_4, %c0_5] : memref<8x128xf32, #tpu.memory_space<vmem>>, vector<8x128xf32>
    tpu.vector_store %arg3[%c0_4, %c0_5], %17 {strides = array<i32>} : memref<8x128xf32, #tpu.memory_space<vmem>>, vector<8x128xf32>,
    return
  }
  func.func @transform_0(%arg0: i32) -> i32 {
    %c0_i32 = arith.constant 0 : i32
    %c0_i32_0 = arith.constant 0 : i32
    return %c0_i32 : i32
  }
  func.func @transform_1(%arg0: i32) -> (i32, i32) {
    %c0_i32 = arith.constant 0 : i32
    %c0_i32_0 = arith.constant 0 : i32
    return %arg0, %c0_i32 : i32, i32
  }
  func.func @transform_2(%arg0: i32) -> (i32, i32) {
    %c0_i32 = arith.constant 0 : i32
    %c0_i32_0 = arith.constant 0 : i32
    return %arg0, %c0_i32 : i32, i32
  }
}

</mosaic_0001>

<bundles_post_ra>
// kernel: tpu_custom_call.1
= control target key start
LH: loop header
LB: loop body
LE: loop exit
PB: predicated region body
PF: predicated region fallthrough
CT: control target
= control target key end

     0   :  { %s600_s0 = inlined_call_operand.<no memory space> [shape: f32[1], index: 0, kind: input, shape index: {}]   ;;  %s601_s1 = inlined_call_operand.hbm [shape: f32[64,128], index: 1, kind: input, shape index: {}]   ;;  %s602_s2 = inlined_call_operand.hbm [shape: f32[64,128], index: 2, kind: output, shape index: {}]  }
   0x1   :  { %7 = sst [smem:[#allocation2]] %s600_s0 }
   0x2   :  { %8 = vsyncpa [#allocation4], 0 }
   0x3   :  { %10 = vsyncpa [#allocation4 + $0x1], 0 }
   0x4   :  { %11 = vsyncpa [#allocation5], 0 }
   0x5   :  { %13 = vsyncpa [#allocation5 + $0x1], 0  ;;  %s441_s11 = smov 0   ;;  %s443_s12 = smov 0  }
   0x6   :  { %s445_s13 = smov 0   ;;  %s447_s14 = smov 0  }
   0x7 LB: > { %s462_s0 = sadd.s32 4294967295, %s419_s14   ;;  %s261_s15 = sadd.s32 4294967294, %s419_s14   ;;  %s419_s14 = sphi %s447_s14, %s616_s14   ;;  %s415_s13 = sphi %s445_s13, %s615_s13   ;;  %s411_s12 = sphi %s443_s12, %s614_s12   ;;  %s407_s11 = sphi %s441_s11, %s613_s11  }
   0x8   : > { %s466_s16 = sadd.s32 1, %s419_s14   ;;  %s47_s17 = sadd.s32 1, %s415_s13 }
   0x9   : > { %s44_s18 = ssub.s32 %s419_s14, %s466_s16  ;;  %p54_p0 = scmp.ne.s32.totalorder %s415_s13, %s411_s12 }
   0xa   : > { %p45_p1 = scmp.eq.s32.totalorder %s44_s18, 0  ;;  %p55_p2 = scmp.eq.s32.totalorder %s419_s14, 0 }
   0xb   : > { %p60_p3 = scmp.ne.s32.totalorder %s411_s12, %s407_s11  ;;  %p61_p4 = scmp.eq.s32.totalorder %s462_s0, 0 }
   0xc   : > { %s478_s19 = scalar_select %p45_p1, %s415_s13, %s47_s17  }
   0xd   : > { %p480_p5 = por %p55_p2, %p54_p0  ;;  %p484_p6 = por %p61_p4, %p60_p3 }
   0xe   : > { %p84_p7 = scmp.eq.s32.totalorder %s462_s0, 7  ;;  %p90_p8 = scmp.eq.s32.totalorder %s261_s15, 7 }
   0xf   : > { %p285_p9 = scmp.lt.s32.totalorder %s419_s14, 8  ;;  %s113_s24 = sand.u32 1, %s415_s13  }
  0x10   : > { %p490_p10 = por %p84_p7, %p54_p0  ;;  %p494_p11 = por %p90_p8, %p60_p3 }
  0x11   : > { %s265_s25 = sshll.u32 %s419_s14, 7  ;;  %s264_s26 = sshll.u32 %s113_s24, 3 }
  0x12   : > { %s606_s22 = scalar_select %p490_p10, 1, 0 }
  0x13   : > { %s607_s23 = scalar_select %p494_p11, 1, 0 }
  0x14   : > { %s503_s29 = scalar_lea.hbm %s601_s1, %s265_s25  ;;  %s117_s30 = scalar_lea.vmem [#allocation3], %s264_s26 }
  0x15   : > { %s124_s3 = sshll.u32 %s117_s30, 4  ;;  %p507_p12 = pnand %p285_p9, %p480_p5  ;;  %s511_s3 = int_to_ptr.vmem [resolvable:$true] %s124_s3 }
  0x16   : > { %s114_s5 = scalar_lea.sflag [#allocation4], %s113_s24  ;;  %s323_s6 = scalar_lea.hbm %s503_s29, 128 }
  0x17   : > { %p324_p1 = scmp.ne.s32.totalorder %s503_s29, %s323_s6  ;;  %p325_p2 = pneg %p507_p12 }
  0x18   : > { %s328_s9 = scalar_lea.hbm %s601_s1, 1024  ;;  %p329_p5 = scmp.lt.u32.totalorder %s503_s29, %s601_s1 }
  0x19   : > { %p326_p3 = pnand %p325_p2, %p324_p1  ;;  %p330_p7 = scmp.lt.u32.totalorder %s328_s9, %s323_s6 }
  0x1a   : > { %p332_p9 = scmp.lt.u32.totalorder %s323_s6, %s503_s29 }
  0x1b   : > { %p327_p4 = pneg %p326_p3  ;;  %p331_p8 = por %p330_p7, %p329_p5 }
  0x1d   : > { %p333_p13 = por %p332_p9, %p331_p8 }
  0x1f   : > { %p334_p0 = pnand %p333_p13, %p327_p4 }
  0x21   : > { %337 = shalt.err (!%p334_p0)
}
  0x22   : > { %s338_s17 = scalar_lea.vmem %s511_s3, 128  ;;  %s421_s18 = smov [#allocation3]  }
  0x23   : > { %p339_p1 = scmp.ne.s32.totalorder %s511_s3, %s338_s17  ;;  %s343_s20 = sshll.u32 %s421_s18, 4  ;;  %s344_s20 = int_to_ptr.vmem [resolvable:$false] %s343_s20 }
  0x24   : > { %s345_s24 = scalar_lea.vmem %s344_s20, 256  ;;  %p346_p10 = scmp.lt.s32.totalorder %s511_s3, %s344_s20 }
  0x25   : > { %p341_p3 = pnand %p339_p1, %p325_p2  ;;  %p347_p5 = scmp.lt.s32.totalorder %s345_s24, %s338_s17 }
  0x27   : > { %p342_p11 = pneg %p341_p3  ;;  %p348_p7 = por %p347_p5, %p346_p10 }
  0x29   : > { %p349_p8 = pnand %p348_p7, %p342_p11 }
  0x2b   : > { %352 = shalt.err (!%p349_p8)
}
  0x2c   : > { %280 = dma.hbm_to_vmem [thread:$0]  (!%p507_p12), %s503_s29, 128, %s511_s3, %s114_s5  }
  0x2d   : > { %p609_p13 = scmp.lt.s32.totalorder %s419_s14, 9  ;;  %p610_p0 = scmp.ge.s32.totalorder %s419_s14, 1 }
  0x2f   : > { %p130_p2 = pnand %p610_p0, %p609_p13 }
  0x30   : > { %s545_s25 = sand.u32 (!%p130_p2), 1, %s411_s12  }
  0x31   : > { %133 = sbr.rel (%p130_p2) target bundleno = 392 (0x188), region = 28  ;;  %s267_s26 = sshll.u32 (!%p130_p2), %s545_s25, 3 }
  0x32   : > { %s136_s27 = scalar_lea.sflag (!%p130_p2), [#allocation4], %s545_s25  ;;  %s139_s28 = scalar_lea.vmem (!%p130_p2), [#allocation3], %s267_s26 }
  0x38   : > { %398 = dma.done.wait (%p484_p6), %s136_s27, 128  }
  0x39   : > { %400 = vsyncadd (%p484_p6), %s136_s27, 4294967168  ;;  %v161_v0 = vld [vmem:[%s139_s28] sm:$0xff]  ;;  %s160_s29 = sld [smem:[#allocation2]]  ;;  %s270_s21 = sshll.u32 %s462_s0, 7 }
  0x3a   : > { %162 = vmax.xlane.f32.xlu0 %v161_v0  ;;  %s159_s30 = scalar_lea.vmem [#allocation6], %s267_s26  ;;  %s557_s6 = scalar_lea.hbm %s602_s2, %s270_s21 }
  0x3b   : > { %s191_s3 = sshll.u32 %s159_s30, 4  ;;  %s178_s7 = scalar_lea.sflag [#allocation5], %s545_s25  ;;  %s559_s3 = int_to_ptr.vmem [resolvable:$true] %s191_s3 }
  0x3c   : > { %s353_s8 = scalar_lea.vmem %s559_s3, 128  ;;  %p611_p10 = scmp.ne.s32.totalorder %s606_s22, 0 }
  0x3d   : > { %p354_p6 = scmp.ne.s32.totalorder %s559_s3, %s353_s8  ;;  %s422_s0 = smov [#allocation6]  }
  0x3e   : > { %s357_s9 = sshll.u32 %s422_s0, 4  ;;  %s358_s9 = int_to_ptr.vmem [resolvable:$false] %s357_s9 }
  0x3f   : > { %v165_v2 = vstv %s160_s29  ;;  %p355_p11 = pnand %p354_p6, %p611_p10  ;;  %s359_s10 = scalar_lea.vmem %s358_s9, 256 }
  0x40   : > { %p360_p4 = scmp.lt.s32.totalorder %s559_s3, %s358_s9  ;;  %p361_p9 = scmp.lt.s32.totalorder %s359_s10, %s353_s8 }
  0x41   : > { %p356_p12 = pneg %p355_p11 }
  0x42   : > { %p362_p1 = por %p361_p9, %p360_p4 }
  0x44   : > { %p363_p3 = pnand %p362_p1, %p356_p12 }
  0xc7   : > { %v163_v1 = vpop.xlane.xlu0 %162 }
  0xc8   : > { %v164_v3 = vsub.f32 %v161_v0, %v163_v1 }
  0xca   : > { %v166_v4 = vmul.f32 %v165_v2, %v164_v3 }
  0xcc   : > { %v167_v5 = vmul.f32 1.442695, %v166_v4 }
  0xce   : > { %319 = vpow2.f32 %v167_v5 }
  0xd8   : > { %v320_v6 = vpop.eup %319 }
  0xd9   : > { %169 = vadd.xlane.f32.xlu0 %v320_v6 }
 0x166   : > { %v170_v7 = vpop.xlane.xlu0 %169 }
 0x167   : > { %321 = vrcp.f32 %v170_v7 }
 0x171   : > { %v322_v8 = vpop.eup %321 }
 0x172   : > { %v172_v9 = vmul.f32 %v322_v8, %v170_v7 }
 0x174   : > { %v173_v10 = vsub.f32 2.0, %v172_v9 }
 0x176   : > { %v174_v11 = vmul.f32 %v322_v8, %v173_v10 }
 0x178   : > { %v175_v12 = vmul.f32 %v320_v6, %v174_v11 }
 0x17a   : > { %176 = vst [vmem:[%s159_s30] sm:$0xff] %v175_v12 }
 0x17b   : > { %366 = shalt.err (!%p363_p3)
}
 0x17c   : > { %s367_s15 = scalar_lea.hbm %s557_s6, 128  ;;  %s371_s20 = scalar_lea.hbm %s602_s2, 1024 }
 0x17d   : > { %p368_p5 = scmp.ne.s32.totalorder %s557_s6, %s367_s15  ;;  %p372_p13 = scmp.lt.u32.totalorder %s557_s6, %s602_s2 }
 0x17e   : > { %p373_p0 = scmp.lt.u32.totalorder %s371_s20, %s367_s15  ;;  %p375_p6 = scmp.lt.u32.totalorder %s367_s15, %s557_s6 }
 0x17f   : > { %p369_p7 = pnand %p368_p5, %p611_p10 }
 0x180   : > { %p374_p2 = por %p373_p0, %p372_p13 }
 0x181   : > { %p370_p8 = pneg %p369_p7 }
 0x182   : > { %p376_p11 = por %p375_p6, %p374_p2 }
 0x184   : > { %p377_p12 = pnand %p376_p11, %p370_p8 }
 0x186   : > { %380 = shalt.err (!%p377_p12)
}
 0x187   : > { %275 = dma.vmem_to_hbm [thread:$0]  (%p611_p10), %s559_s3, 128, %s557_s6, %s178_s7  }
 0x188 PF: > { %p286_p4 = scmp.ge.s32.totalorder %s419_s14, 2  ;;  %s203_s26 = sand.u32 1, %s407_s11  }
 0x189   : > { %p612_p9 = scmp.ne.s32.totalorder %s607_s23, 0  ;;  %s204_s27 = scalar_lea.sflag [#allocation5], %s203_s26 }
 0x18b   : > { %p282_p1 = pnand %p286_p4, %p612_p9 }
 0x18d   : > { %402 = dma.done.wait (!%p282_p1), %s204_s27, 128  }
 0x18e   : > { %404 = vsyncadd (!%p282_p1), %s204_s27, 4294967168  ;;  %p16_p3 = scmp.ge.s32.totalorder %s466_s16, 10   ;;  %s613_s11 = smov %s411_s12 }
 0x18f   : > { %s614_s12 = smov %s415_s13  ;;  %s615_s13 = smov %s478_s19 }
 0x190   : > { %s616_s14 = smov %s466_s16  ;;  %18 = sbr.rel (!%p16_p3) target bundleno = 7 (0x7), region = 73 }
 0x197   :  { %209 = vsyncpa [#allocation4], 1 }
 0x198   :  { %211 = vsyncpa [#allocation4 + $0x1], 1 }
 0x199   :  { %212 = vsyncpa [#allocation5], 1 }
 0x19a   :  { %214 = vsyncpa [#allocation5 + $0x1], 1 }

</bundles_post_ra>
